<compile_context>
chip_gen: v7x
topology: tpu7x:2x2x1
jax: 0.10.0
libtpu: 0.0.40
codegen_flags: <defaults>
</compile_context>

<pallas_src>
import math

import jax
import jax.numpy as jnp
from jax.experimental import pallas as pl
from jax.experimental.pallas import tpu as pltpu

_INV_SQRT2 = 1.0 / math.sqrt(2.0)


def _round_up(n, m):
    return ((n + m - 1) // m) * m


def _cdiv(a, b):
    return (a + b - 1) // b


def _tpu_vmem_capacity_bytes():
    try:
        return int(pltpu.get_tpu_info().vmem_capacity_bytes)
    except Exception:
        return 64 * 1024 * 1024          # conservative fallback (v7x physical)


def _num_tensorcores():
    try:
        dev = jax.devices()[0]
        kind = (getattr(dev, "device_kind", "") or "").lower()
        if "v7" in kind:
            return 2
        return max(1, int(getattr(dev, "num_cores", 1) or 1))
    except Exception:
        return 1


def _vmem_bytes_per_step(tm, tf, H, out_itemsize, lo_itemsize=2):
    """Conservative per-grid-step VMEM estimate (double-buffered pipeline)."""
    b = 2 * tm * H * lo_itemsize                  # x block (double-buffered)
    b += 2 * 2 * H * tf * lo_itemsize             # W1 + W2 blocks
    b += 2 * (tf + H) * 4                         # biases (f32)
    b += 2 * tm * H * out_itemsize                # output block
    b += tm * H * 4                               # f32 accumulator scratch
    b += tm * tf * (4 + lo_itemsize)              # h (f32) + g (bf16) interm.
    return b


def _choose_tiles(M, H, F, vmem_cap, n_cores, out_itemsize):
    """Pick (tm, tf) for this device's VMEM size and TensorCore count."""
    budget = int(vmem_cap * 0.60)                 # headroom for compiler scratch
    M8 = _round_up(max(M, 1), 8)
    F128 = _round_up(max(F, 1), 128)

    # Row tile: target 1024 rows (weight-stream amortization); derive it from
    # a row-tile count that minimizes M padding and, on megacore parts, is a
    # multiple of the TensorCore count so both TCs get work.
    n_tiles = max(1, _cdiv(M8, 1024))
    if n_cores > 1 and M8 >= 16 * n_cores:
        n_tiles = _round_up(n_tiles, n_cores)
    tm = _round_up(_cdiv(M8, n_tiles), 8)

    # FFN tile: largest multiple of 128 that fits the budget with this tm.
    # Prefer candidates that divide the padded F (no extra F padding).
    cands = [F128] + [t for t in (4096, 2048, 1024, 512, 256, 128) if t < F128]
    cands = ([c for c in cands if F128 % c == 0] +
             [c for c in cands if F128 % c != 0])
    tf = None
    for cand in cands:
        if _vmem_bytes_per_step(tm, cand, H, out_itemsize) <= budget:
            tf = cand
            break
    if tf is None:                                # tiny-VMEM fallback: shrink tm
        tf = min(128, F128)
        while tm > 8 and _vmem_bytes_per_step(tm, tf, H, out_itemsize) > budget:
            tm = _round_up(tm // 2, 8)
    return tm, tf


def _gelu(h, approximate):
    if approximate:
        # tanh approximation routes to the EUP slot (off the VALU critical path)
        return jax.nn.gelu(h, approximate=True)
    # exact erf GELU: matches nn.GELU(approximate='none') (PyTorch default)
    return 0.5 * h * (1.0 + jax.lax.erf(h * _INV_SQRT2))


def _make_fullf_kernel(approximate_gelu):
    """Single F tile: W1/W2 fully resident, no accumulator scratch needed."""
    def kernel(x_ref, w1_ref, b1_ref, w2_ref, b2_ref, o_ref):
        h = jnp.dot(x_ref[...], w1_ref[...], preferred_element_type=jnp.float32)
        h = h + b1_ref[...]                                    # f32 bias add
        g = _gelu(h, approximate_gelu)
        y = jnp.dot(g.astype(w2_ref.dtype), w2_ref[...],
                    preferred_element_type=jnp.float32) + b2_ref[...]
        o_ref[...] = y.astype(o_ref.dtype)
    return kernel


def _make_ftiled_kernel(approximate_gelu):
    """F-tiled path: f32 VMEM accumulator carried across the (last) F axis."""
    def kernel(x_ref, w1_ref, b1_ref, w2_ref, b2_ref, o_ref, acc_ref):
        f = pl.program_id(1)

        # Fold "+ b2" into the reduction: init accumulator with broadcast b2.
        @pl.when(f == 0)
        def _():
            acc_ref[...] = jnp.broadcast_to(b2_ref[...], acc_ref.shape)

        h = jnp.dot(x_ref[...], w1_ref[...], preferred_element_type=jnp.float32)
        h = h + b1_ref[...]
        g = _gelu(h, approximate_gelu)
        acc_ref[...] += jnp.dot(g.astype(w2_ref.dtype), w2_ref[...],
                                preferred_element_type=jnp.float32)

        @pl.when(f == pl.num_programs(1) - 1)
        def _():
            o_ref[...] = acc_ref[...].astype(o_ref.dtype)
    return kernel


def prepare_ffn_params(params, *, compute_dtype=jnp.bfloat16):
    """One-time cast of W1/W2 to the MXU compute dtype (hoists the per-call
    f32->bf16 cast out of the hot path).  Biases stay f32."""
    w1, b1, w2, b2 = params
    return (jnp.asarray(w1, compute_dtype), jnp.asarray(b1, jnp.float32),
            jnp.asarray(w2, compute_dtype), jnp.asarray(b2, jnp.float32))


def ffn_pallas(x, w1, b1, w2, b2, *, tile_m=None, tile_f=None,
               compute_dtype=jnp.bfloat16, out_dtype=None,
               approximate_gelu=False):
    """x: (M, H); w1: (H, F); b1: (F,); w2: (F, H); b2: (H,)  ->  (M, H)."""
    M, H = x.shape
    F = w1.shape[1]
    out_dtype = x.dtype if out_dtype is None else out_dtype
    out_itemsize = jnp.dtype(out_dtype).itemsize
    lo_itemsize = jnp.dtype(compute_dtype).itemsize

    vmem_cap = _tpu_vmem_capacity_bytes()
    n_cores = _num_tensorcores()
    auto_tm, auto_tf = _choose_tiles(M, H, F, vmem_cap, n_cores, out_itemsize)
    tm = auto_tm if tile_m is None else min(_round_up(tile_m, 8),
                                            _round_up(M, 8))
    tf = auto_tf if tile_f is None else min(_round_up(tile_f, 128),
                                            _round_up(F, 128))

    M_pad = _round_up(M, tm)
    F_pad = _round_up(F, tf)

    # Padding is exact: gelu(x@0 + 0) = 0 contributes nothing; padded rows
    # are sliced off at the end.  With adaptive tm, M padding is at most a
    # few rows (to a multiple of 8) for small M.
    x_p = x if M_pad == M else jnp.pad(x, ((0, M_pad - M), (0, 0)))
    if F_pad != F:
        w1 = jnp.pad(w1, ((0, 0), (0, F_pad - F)))
        b1 = jnp.pad(b1, ((0, F_pad - F),))
        w2 = jnp.pad(w2, ((0, F_pad - F), (0, 0)))

    # No-ops if the params were pre-cast via prepare_ffn_params.
    x_lo = x_p.astype(compute_dtype)
    w1_lo = w1.astype(compute_dtype)
    w2_lo = w2.astype(compute_dtype)
    b1_2d = b1.reshape(1, F_pad).astype(jnp.float32)
    b2_2d = b2.reshape(1, H).astype(jnp.float32)

    n_row_tiles = M_pad // tm
    n_f_tiles = F_pad // tf

    # Weights are re-streamed once per row tile only when F is tiled; with a
    # single F tile their block index never changes and they are DMA'd once.
    weight_passes = n_row_tiles if n_f_tiles > 1 else 1
    cost = pl.CostEstimate(
        flops=4 * M_pad * H * F_pad,               # two matmuls, 2 flops/MAC
        transcendentals=M_pad * F_pad,             # erf/tanh in the GELU
        bytes_accessed=(x_lo.size * lo_itemsize
                        + weight_passes * (w1_lo.size + w2_lo.size) * lo_itemsize
                        + b1_2d.size * 4 + b2_2d.size * 4
                        + M_pad * H * out_itemsize),
    )
    vmem_limit = int(vmem_cap * 0.75)              # 96 MiB v5e/v6e, 48 MiB v7x

    if n_f_tiles == 1:
        out = pl.pallas_call(
            _make_fullf_kernel(approximate_gelu),
            out_shape=jax.ShapeDtypeStruct((M_pad, H), out_dtype),
            grid_spec=pltpu.PrefetchScalarGridSpec(
                num_scalar_prefetch=0,
                grid=(n_row_tiles,),
                in_specs=[
                    pl.BlockSpec((tm, H), lambda i: (i, 0)),        # x row tile
                    pl.BlockSpec((H, F_pad), lambda i: (0, 0)),     # W1 (resident)
                    pl.BlockSpec((1, F_pad), lambda i: (0, 0)),     # b1
                    pl.BlockSpec((F_pad, H), lambda i: (0, 0)),     # W2 (resident)
                    pl.BlockSpec((1, H), lambda i: (0, 0)),         # b2
                ],
                out_specs=pl.BlockSpec((tm, H), lambda i: (i, 0)),
            ),
            compiler_params=pltpu.CompilerParams(
                dimension_semantics=("parallel",),
                vmem_limit_bytes=vmem_limit),
            cost_estimate=cost,
        )(x_lo, w1_lo, b1_2d, w2_lo, b2_2d)
    else:
        out = pl.pallas_call(
            _make_ftiled_kernel(approximate_gelu),
            out_shape=jax.ShapeDtypeStruct((M_pad, H), out_dtype),
            grid_spec=pltpu.PrefetchScalarGridSpec(
                num_scalar_prefetch=0,
                grid=(n_row_tiles, n_f_tiles),
                in_specs=[
                    pl.BlockSpec((tm, H), lambda i, f: (i, 0)),     # x row tile
                    pl.BlockSpec((H, tf), lambda i, f: (0, f)),     # W1 f-slab
                    pl.BlockSpec((1, tf), lambda i, f: (0, f)),     # b1 f-slab
                    pl.BlockSpec((tf, H), lambda i, f: (f, 0)),     # W2 f-slab
                    pl.BlockSpec((1, H), lambda i, f: (0, 0)),      # b2
                ],
                out_specs=pl.BlockSpec((tm, H), lambda i, f: (i, 0)),
                scratch_shapes=[pltpu.VMEM((tm, H), jnp.float32)],
            ),
            compiler_params=pltpu.CompilerParams(
                dimension_semantics=("parallel", "arbitrary"),
                vmem_limit_bytes=vmem_limit),
            cost_estimate=cost,
        )(x_lo, w1_lo, b1_2d, w2_lo, b2_2d)

    return out if M_pad == M else out[:M]


def init_ffn_params(key, hidden_size, ffn_size, dtype=jnp.float32):
    """Deterministic init mirroring nn.Linear's default (Kaiming-uniform-ish)."""
    k1, k2, k3, k4 = jax.random.split(key, 4)
    bound1 = 1.0 / math.sqrt(hidden_size)
    bound2 = 1.0 / math.sqrt(ffn_size)
    # stored as (in, out) so the kernel computes x @ W directly
    w1 = jax.random.uniform(k1, (hidden_size, ffn_size), dtype, -bound1, bound1)
    b1 = jax.random.uniform(k2, (ffn_size,), dtype, -bound1, bound1)
    w2 = jax.random.uniform(k3, (ffn_size, hidden_size), dtype, -bound2, bound2)
    b2 = jax.random.uniform(k4, (hidden_size,), dtype, -bound2, bound2)
    return w1, b1, w2, b2


def feed_forward_network(x, params, *, tile_m=None, tile_f=None,
                         approximate_gelu=False):
    """x: (batch, seq, hidden) -> (batch, seq, hidden).

    `params` may be the raw f32 weights or the output of prepare_ffn_params
    (pre-cast to bf16; avoids a per-call cast over the full weights)."""
    # TODO(synk): dropout_rate in the PyTorch module is never used in
    # forward(), so no dropout is applied here.
    w1, b1, w2, b2 = params
    B, S, H = x.shape
    y2d = ffn_pallas(x.reshape(B * S, H), w1, b1, w2, b2,
                     tile_m=tile_m, tile_f=tile_f,
                     approximate_gelu=approximate_gelu)
    return y2d.reshape(B, S, H)


if __name__ == "__main__":
    batch, seq, hidden, ffn = 2, 8, 32, 64
    key = jax.random.PRNGKey(0)
    kx, kp = jax.random.split(key)

    x = jax.random.normal(kx, (batch, seq, hidden), dtype=jnp.float32)
    params = init_ffn_params(kp, hidden, ffn)

    # Hoist the f32 -> bf16 weight cast out of the per-call hot path.
    prepared = prepare_ffn_params(params)

    y = feed_forward_network(x, prepared)
    y = jax.block_until_ready(y)

    # pure-JAX f32 reference (exact erf GELU, matching nn.GELU default)
    w1, b1, w2, b2 = params
    h = x @ w1 + b1
    g = 0.5 * h * (1.0 + jax.lax.erf(h / jnp.sqrt(2.0)))
    y_ref = g @ w2 + b2

    assert y.shape == (batch, seq, hidden)
    assert bool(jnp.all(jnp.isfinite(y)))
    # kernel uses bf16 MXU operands with f32 accumulation -> modest tolerance
    max_err = float(jnp.max(jnp.abs(y - y_ref)))
    assert jnp.allclose(y, y_ref, atol=3e-2, rtol=3e-2), (
        f"mismatch vs reference: max abs err = {max_err}")

    print("KERNEL_OK")
</pallas_src>

<mosaic_0001>
module attributes {stable_mosaic.version = 11 : i64} {
  func.func @kernel(%arg0: i32, %arg1: memref<16x32xbf16, #tpu.memory_space<vmem>>, %arg2: memref<32x128xbf16, #tpu.memory_space<vmem>>, %arg3: memref<1x128xf32, #tpu.memory_space<vmem>>, %arg4: memref<128x32xbf16, #tpu.memory_space<vmem>>, %arg5: memref<1x32xf32, #tpu.memory_space<vmem>>, %arg6: memref<16x32xf32, #tpu.memory_space<vmem>>) attributes {dimension_semantics = [#tpu.dimension_semantics<parallel>], iteration_bounds = array<i64: 1>, scalar_prefetch = 0 : i64, scratch_operands = 0 : i64, tpu.core_type = #tpu.core_type<tc>, window_params = [{transform_indices = @transform_0, window_bounds = array<i64: 16, 32>}, {pipeline_mode = #tpu.pipeline_mode<synchronous>, transform_indices = @transform_1, window_bounds = array<i64: 32, 128>}, {pipeline_mode = #tpu.pipeline_mode<synchronous>, transform_indices = @transform_2, window_bounds = array<i64: 1, 128>}, {pipeline_mode = #tpu.pipeline_mode<synchronous>, transform_indices = @transform_3, window_bounds = array<i64: 128, 32>}, {pipeline_mode = #tpu.pipeline_mode<synchronous>, transform_indices = @transform_4, window_bounds = array<i64: 1, 32>}, {transform_indices = @transform_5, window_bounds = array<i64: 16, 32>}]} {
    %c0 = arith.constant 0 : index
    %c0_0 = arith.constant 0 : index
    %0 = vector.load %arg1[%c0, %c0_0] : memref<16x32xbf16, #tpu.memory_space<vmem>>, vector<16x32xbf16>
    %c0_1 = arith.constant 0 : index
    %c0_2 = arith.constant 0 : index
    %1 = vector.load %arg2[%c0_1, %c0_2] : memref<32x128xbf16, #tpu.memory_space<vmem>>, vector<32x128xbf16>
    %cst = arith.constant dense<0.000000e+00> : vector<16x128xf32>
    %2 = tpu.matmul %0, %1, %cst {dimension_numbers = #tpu.dot_dimension_numbers<[1], [0], [0], [1], [0, 0, 1, 1], [], []>} : vector<16x32xbf16>, vector<32x128xbf16>, vector<16x128xf32> -> vector<16x128xf32>
    %c0_3 = arith.constant 0 : index
    %c0_4 = arith.constant 0 : index
    %3 = vector.load %arg3[%c0_3, %c0_4] : memref<1x128xf32, #tpu.memory_space<vmem>>, vector<1x128xf32>
    %4 = vector.broadcast %3 : vector<1x128xf32> to vector<16x128xf32>
    %5 = arith.addf %2, %4 : vector<16x128xf32>
    %cst_5 = arith.constant 5.000000e-01 : f32
    %6 = vector.broadcast %cst_5 : f32 to vector<16x128xf32>
    %7 = arith.mulf %6, %5 : vector<16x128xf32>
    %cst_6 = arith.constant 0.707106769 : f32
    %8 = vector.broadcast %cst_6 : f32 to vector<16x128xf32>
    %9 = arith.mulf %5, %8 : vector<16x128xf32>
    %10 = math.erf %9 : vector<16x128xf32>
    %cst_7 = arith.constant 1.000000e+00 : f32
    %11 = vector.broadcast %cst_7 : f32 to vector<16x128xf32>
    %12 = arith.addf %11, %10 : vector<16x128xf32>
    %13 = arith.mulf %7, %12 : vector<16x128xf32>
    %14 = arith.truncf %13 : vector<16x128xf32> to vector<16x128xbf16>
    %c0_8 = arith.constant 0 : index
    %c0_9 = arith.constant 0 : index
    %15 = vector.load %arg4[%c0_8, %c0_9] : memref<128x32xbf16, #tpu.memory_space<vmem>>, vector<128x32xbf16>
    %cst_10 = arith.constant dense<0.000000e+00> : vector<16x32xf32>
    %16 = tpu.matmul %14, %15, %cst_10 {dimension_numbers = #tpu.dot_dimension_numbers<[1], [0], [0], [1], [0, 0, 1, 1], [], []>} : vector<16x128xbf16>, vector<128x32xbf16>, vector<16x32xf32> -> vector<16x32xf32>
    %c0_11 = arith.constant 0 : index
    %c0_12 = arith.constant 0 : index
    %17 = vector.load %arg5[%c0_11, %c0_12] : memref<1x32xf32, #tpu.memory_space<vmem>>, vector<1x32xf32>
    %18 = vector.broadcast %17 : vector<1x32xf32> to vector<16x32xf32>
    %19 = arith.addf %16, %18 : vector<16x32xf32>
    %c0_13 = arith.constant 0 : index
    %c0_14 = arith.constant 0 : index
    %20 = vector.load %arg6[%c0_13, %c0_14] : memref<16x32xf32, #tpu.memory_space<vmem>>, vector<16x32xf32>
    tpu.vector_store %arg6[%c0_13, %c0_14], %19 {strides = array<i32>} : memref<16x32xf32, #tpu.memory_space<vmem>>, vector<16x32xf32>,
    return
  }
  func.func @transform_0(%arg0: i32) -> (i32, i32) {
    %c0_i32 = arith.constant 0 : i32
    %c0_i32_0 = arith.constant 0 : i32
    return %arg0, %c0_i32 : i32, i32
  }
  func.func @transform_1(%arg0: i32) -> (i32, i32) {
    %c0_i32 = arith.constant 0 : i32
    %c0_i32_0 = arith.constant 0 : i32
    %c0_i32_1 = arith.constant 0 : i32
    return %c0_i32, %c0_i32_0 : i32, i32
  }
  func.func @transform_2(%arg0: i32) -> (i32, i32) {
    %c0_i32 = arith.constant 0 : i32
    %c0_i32_0 = arith.constant 0 : i32
    %c0_i32_1 = arith.constant 0 : i32
    return %c0_i32, %c0_i32_0 : i32, i32
  }
  func.func @transform_3(%arg0: i32) -> (i32, i32) {
    %c0_i32 = arith.constant 0 : i32
    %c0_i32_0 = arith.constant 0 : i32
    %c0_i32_1 = arith.constant 0 : i32
    return %c0_i32, %c0_i32_0 : i32, i32
  }
  func.func @transform_4(%arg0: i32) -> (i32, i32) {
    %c0_i32 = arith.constant 0 : i32
    %c0_i32_0 = arith.constant 0 : i32
    %c0_i32_1 = arith.constant 0 : i32
    return %c0_i32, %c0_i32_0 : i32, i32
  }
  func.func @transform_5(%arg0: i32) -> (i32, i32) {
    %c0_i32 = arith.constant 0 : i32
    %c0_i32_0 = arith.constant 0 : i32
    return %arg0, %c0_i32 : i32, i32
  }
}

</mosaic_0001>

<bundles_post_ra>
// kernel: tpu_custom_call.1
= control target key start
LH: loop header
LB: loop body
LE: loop exit
PB: predicated region body
PF: predicated region fallthrough
CT: control target
= control target key end

     0   :  { %v336_v1 = vmov 0.0   ;;  %vm337_vm0 = vmmov 0   ;;  %vm52_vm1 = vcmask 261120   ;;  %s425_s0 = inlined_call_operand.vmem [shape: bf16[16,32], index: 0, kind: input, shape index: {}]   ;;  %s426_s1 = inlined_call_operand.vmem [shape: bf16[32,128], index: 1, kind: input, shape index: {}]   ;;  %s427_s2 = inlined_call_operand.vmem [shape: f32[1,128], index: 2, kind: input, shape index: {}]   ;;  %s428_s3 = inlined_call_operand.vmem [shape: bf16[128,32], index: 3, kind: input, shape index: {}]   ;;  %s429_s4 = inlined_call_operand.vmem [shape: f32[1,32], index: 4, kind: input, shape index: {}]   ;;  %s430_s5 = inlined_call_operand.hbm [shape: f32[16,32], index: 5, kind: output, shape index: {}]  }
   0x1   :  { %v297_v0 = vld [vmem:[%s426_s1] sm:$0xff]   ;;  %264 = vmatprep.subr.bf16.mxu0 %v336_v1  ;;  %272 = vmatprep.subr.bf16.mxu1 %v336_v1  ;;  %v298_v2 = vld [vmem:[%s426_s1 + $0x8] sm:$0xff]  }
   0x2   :  { %265 = vmatpush3.bf16.msra.mxu0 %v297_v0  ;;  %268 = vmatprep.mubr.msk.bf16.mxu0 %vm337_vm0, %v336_v1  ;;  %v300_v3 = vld [vmem:[%s428_s3] sm:$0xff]   ;;  %v301_v5 = vld [vmem:[%s428_s3 + $0x8] sm:$0xff]  }
   0x3   :  { %266 = vmatprep.subr.bf16.mxu0 %v336_v1  ;;  %288 = vmatprep.mubr.msk.bf16.mxu1 %vm337_vm0, %v336_v1  ;;  %v299_v4 = vld [vmem:[%s425_s0] sm:$0xff]  }
   0x4   :  { %273 = vmatpush3.bf16.msra.mxu1 %v300_v3 }
   0x5   :  { %274 = vmatprep.subr.bf16.mxu1 %v336_v1 }
   0x6   :  { %267 = vmatpush3.bf16.msra.mxu0 %v298_v2 }
   0x8   :  { %275 = vmatpush3.bf16.msra.mxu1 %v301_v5 }
   0x9   :  { %269 = vmatmul.mubr.msk.bf16.vlgmr.msra.gmra.mrb[0].mxu0 %vm52_vm1, %v299_v4 }
   0xa   :  { %10 = vsyncpa [#allocation3], 0  ;;  %276 = vmatprep.subr.bf16.mxu1 %v336_v1  ;;  %v302_v6 = vld [vmem:[%s428_s3 + $0x10] sm:$0xff]   ;;  %v303_v7 = vld [vmem:[%s428_s3 + $0x18] sm:$0xff]   ;;  %s338_s15 = smov [#allocation2]  }
   0xb   :  { %v304_v8 = vld [vmem:[%s428_s3 + $0x20] sm:$0xff]   ;;  %v305_v9 = vld [vmem:[%s428_s3 + $0x28] sm:$0xff]   ;;  %v306_v10 = vld [vmem:[%s428_s3 + $0x30] sm:$0xff]   ;;  %s227_s16 = sshll.u32 %s338_s15, 4  ;;  %s228_s16 = int_to_ptr.vmem [resolvable:$true] %s227_s16 }
   0xc   :  { %277 = vmatpush3.bf16.msra.mxu1 %v302_v6  ;;  %v307_v11 = vld [vmem:[%s428_s3 + $0x38] sm:$0xff]   ;;  %v238_v12 = vld [vmem:[%s427_s2] ss:$0 sm:$0xff]  ;;  %s312_s17 = scalar_lea.vmem %s228_s16, 256  ;;  %p317_p1 = scmp.lt.s32.totalorder %s228_s16, %s228_s16 }
   0xd   :  { %278 = vmatprep.subr.bf16.mxu1 %v336_v1  ;;  %v243_v30 = vld [vmem:[%s429_s4] ss:$0 sm:$0xff]  ;;  %p313_p0 = scmp.ne.s32.totalorder %s228_s16, %s312_s17  ;;  %p318_p2 = scmp.lt.s32.totalorder %s312_s17, %s312_s17 }
   0xf   :  { %p319_p3 = por %p318_p2, %p317_p1 }
  0x10   :  { %279 = vmatpush3.bf16.msra.mxu1 %v303_v7 }
  0x11   :  { %280 = vmatprep.subr.bf16.mxu1 %v336_v1  ;;  %p320_p4 = pnand %p319_p3, %p313_p0 }
  0x14   :  { %281 = vmatpush3.bf16.msra.mxu1 %v304_v8 }
  0x15   :  { %282 = vmatprep.subr.bf16.mxu1 %v336_v1 }
  0x18   :  { %283 = vmatpush3.bf16.msra.mxu1 %v305_v9 }
  0x19   :  { %284 = vmatprep.subr.bf16.mxu1 %v336_v1 }
  0x1c   :  { %285 = vmatpush3.bf16.msra.mxu1 %v306_v10 }
  0x1d   :  { %286 = vmatprep.subr.bf16.mxu1 %v336_v1 }
  0x20   :  { %287 = vmatpush3.bf16.msra.mxu1 %v307_v11 }
  0xdc   :  { %v90_v13 = vpop.f32.mrb[0].mxu0 }
  0xdd   :  { %v91_v14 = vadd.f32 %v238_v12, %v90_v13  ;;  %v270_v15 = vpop.f32.mrb[1].mxu0 }
  0xde   :  { %v93_v16 = vpop.f32.mrb[2].mxu0 }
  0xdf   :  { %v99_v17 = vmul.f32 0.70710677, %v91_v14  ;;  %v94_v18 = vadd.f32 %v238_v12, %v93_v16  ;;  %v271_v19 = vpop.f32.mrb[3].mxu0  ;;  %v97_v24 = vmul.f32 0.5, %v91_v14 }
  0xe1   :  { %308 = verf.f32 %v99_v17  ;;  %v100_v20 = vmul.f32 0.70710677, %v94_v18  ;;  %v98_v25 = vmul.f32 0.5, %v94_v18 }
  0xe3   :  { %310 = verf.f32 %v100_v20 }
  0xeb   :  { %v309_v21 = vpop.eup %308 }
  0xec   :  { %v103_v22 = vadd.f32 1.0, %v309_v21 }
  0xed   :  { %v311_v23 = vpop.eup %310 }
  0xee   :  { %v104_v26 = vadd.f32 1.0, %v311_v23  ;;  %v105_v27 = vmul.f32 %v103_v22, %v97_v24 }
  0xf0   :  { %v106_v28 = vmul.f32 %v104_v26, %v98_v25 }
  0xf2   :  { %v107_v29 = vpack.c.bf16 %v106_v28, %v105_v27 }
  0xf4   :  { %289 = vmatmul.mubr.bf16.vlgmr.msra.gmra.mrb[0].mxu1 %v107_v29 }
 0x1c7   :  { %v213_v31 = vpop.f32.mrb[0].mxu1 }
 0x1c8   :  { %v214_v32 = vadd.f32 %v243_v30, %v213_v31  ;;  %v290_v33 = vpop.f32.mrb[1].mxu1 }
 0x1c9   :  { %v216_v34 = vpop.f32.mrb[2].mxu1 }
 0x1ca   :  { %220 = vst.msk [vmem:[#allocation2] sm:$0xff] %vm52_vm1, %v214_v32  ;;  %v217_v35 = vadd.f32 %v243_v30, %v216_v34  ;;  %v291_v36 = vpop.f32.mrb[3].mxu1 }
 0x1cc   :  { %221 = vst.msk [vmem:[#allocation2 + $0x8] sm:$0xff] %vm52_vm1, %v217_v35 }
 0x1cd   :  { %323 = shalt.err (!%p320_p4)
}
 0x1ce   :  { %s324_s19 = scalar_lea.hbm %s430_s5, 256 }
 0x1cf   :  { %p325_p5 = scmp.ne.s32.totalorder %s430_s5, %s324_s19  ;;  %p328_p6 = scmp.lt.u32.totalorder %s324_s19, %s430_s5 }
 0x1d1   :  { %p330_p7 = pnand %p328_p6, %p325_p5 }
 0x1d3   :  { %333 = shalt.err (!%p330_p7)
}
 0x1d4   :  { %s339_s24 = smov 128   ;;  %s340_s25 = smov 8  }
 0x1d5   :  { %233 = dma.vmem_to_hbm [thread:$0]  %s228_s16, 256, %s430_s5, [#allocation3], %s339_s24, %s339_s24, %s340_s25  }
 0x1d6   :  { %334 = dma.done.wait [#allocation3], 256  }
 0x1d7   :  { %335 = vsyncadd [#allocation3], 4294967040 }
 0x1d8   :  { %237 = vsyncpa [#allocation3], 1 }

</bundles_post_ra>
